<compile_context>
chip_gen: v7x
topology: tpu7x:2x2x1
jax: 0.10.0
libtpu: 0.0.40
codegen_flags: <defaults>
</compile_context>

<pallas_src>
import functools

import jax
import jax.numpy as jnp
from jax import lax
from jax.experimental import pallas as pl
from jax.experimental.pallas import tpu as pltpu

VMEM_SPEC = pl.BlockSpec(memory_space=pltpu.MemorySpace.VMEM)
SMEM_SPEC = pl.BlockSpec(memory_space=pltpu.MemorySpace.SMEM)

MIB = 1024 * 1024
EPS = 1e-8


def _round_up(x, m):
    return ((x + m - 1) // m) * m


def _pad2d(x, rows, cols):
    r, c = x.shape
    if r == rows and c == cols:
        return x
    return jnp.pad(x, ((0, rows - r), (0, cols - c)))


def _plan_gcn(n, n_h, budget_bytes=40 * MIB):
    """Return (n_pad, bm, bk) for the adjacency contraction kernel."""
    if n <= 1024:
        # Single full-extent block: always legal, no padding needed.
        return n, n, n

    bm = 512                       # 128-aligned row tile
    n_pad = _round_up(n, bm)

    def vmem_bytes(bm_, bk_):
        adj = 2 * bm_ * bk_ * 4                 # double-buffered adj tile
        fts = 2 * 2 * bk_ * n_h * 4             # two streams, double-buffered
        out = 2 * 2 * bm_ * n_h * 4             # two outputs, double-buffered
        acc = 2 * bm_ * n_h * 4                 # two accumulators
        return adj + fts + out + acc + 2 * n_h * 4 + 4096

    if vmem_bytes(bm, n_pad) <= budget_bytes:
        bk = n_pad                 # fts effectively resident (grid_k == 1)
    else:
        bk = 1024                  # stream fts / adj columns in 1024 chunks
        n_pad = _round_up(n, max(bm, bk))

    # Balanced megacore split on v7x: keep the row-block count even.
    if (n_pad // bm) > 1 and (n_pad // bm) % 2 == 1:
        bm //= 2                   # 256, still 128-aligned and divides n_pad
    return n_pad, bm, bk


# ------------------------------------------------------------------
# Stage 1: feature transform fts = seq @ W^T (hoisted out of the adj loop).
# ------------------------------------------------------------------
def _fts_pair_kernel(seq_a_ref, seq_b_ref, wt_ref, fa_ref, fb_ref):
    wt = wt_ref[...]                                       # (n_in, n_h) = W^T
    fa_ref[...] = jnp.dot(seq_a_ref[...], wt, preferred_element_type=jnp.float32)
    fb_ref[...] = jnp.dot(seq_b_ref[...], wt, preferred_element_type=jnp.float32)


def _fts_pair(seq_a, seq_b, wt, n_pad):
    n, n_in = seq_a.shape
    n_h = wt.shape[1]
    seq_a_p = _pad2d(seq_a, n_pad, n_in)
    seq_b_p = _pad2d(seq_b, n_pad, n_in)
    bm = n_pad if n_pad <= 1024 else 512
    grid_m = n_pad // bm
    return pl.pallas_call(
        _fts_pair_kernel,
        out_shape=(jax.ShapeDtypeStruct((n_pad, n_h), jnp.float32),) * 2,
        grid=(grid_m,),
        in_specs=[
            pl.BlockSpec((bm, n_in), lambda i: (i, 0)),
            pl.BlockSpec((bm, n_in), lambda i: (i, 0)),
            pl.BlockSpec((n_in, n_h), lambda i: (0, 0)),   # W^T resident
        ],
        out_specs=(pl.BlockSpec((bm, n_h), lambda i: (i, 0)),
                   pl.BlockSpec((bm, n_h), lambda i: (i, 0))),
        compiler_params=pltpu.CompilerParams(
            dimension_semantics=("parallel",),
            vmem_limit_bytes=32 * MIB),
    )(seq_a_p, seq_b_p, wt)


# ------------------------------------------------------------------
# Stage 2 (fused GCN pair):  h_x = PReLU( adj @ fts_x + bias ),  x in {a, b}.
# Grid = (adjacency row blocks, contraction blocks); adj streamed once/call.
# ------------------------------------------------------------------
def _gcn_pair_kernel(fts_a_ref, fts_b_ref, adj_ref, b_ref, a_ref,
                     out_a_ref, out_b_ref, acc_a, acc_b):
    k = pl.program_id(1)

    @pl.when(k == 0)
    def _init():
        acc_a[...] = jnp.zeros_like(acc_a)
        acc_b[...] = jnp.zeros_like(acc_b)

    adj_blk = adj_ref[...]                                  # (bm, bk)
    acc_a[...] += jnp.dot(adj_blk, fts_a_ref[...], preferred_element_type=jnp.float32)
    acc_b[...] += jnp.dot(adj_blk, fts_b_ref[...], preferred_element_type=jnp.float32)

    @pl.when(k == pl.num_programs(1) - 1)
    def _finalize():
        slope = a_ref[0]                                    # PReLU slope (SMEM scalar)
        bias = b_ref[...]                                   # (1, n_h)
        oa = acc_a[...] + bias
        ob = acc_b[...] + bias
        out_a_ref[...] = jnp.where(oa >= 0.0, oa, slope * oa)
        out_b_ref[...] = jnp.where(ob >= 0.0, ob, slope * ob)


def gcn_pair_forward(seq_a, seq_b, adj, wt, bias, prelu_a):
    n, _ = seq_a.shape
    n_h = wt.shape[1]
    n_pad, bm, bk = _plan_gcn(n, n_h)
    grid_m, grid_k = n_pad // bm, n_pad // bk

    # Hoisted feature transform (shared W^T, one pass over the two seqs).
    fts_a, fts_b = _fts_pair(seq_a, seq_b, wt, n_pad)
    # TODO(synk): optionally cast adj/diff to bf16 here (halves the dominant
    # n^2 HBM stream on v6e/v7x) -- skipped to keep float32 reference numerics.
    adj_p = _pad2d(adj, n_pad, n_pad)

    cost = pl.CostEstimate(
        flops=int(4 * n_pad * n_pad * n_h),
        transcendentals=0,
        bytes_accessed=int(4 * (n_pad * n_pad                 # adj streamed once
                                + 2 * grid_m * bk * grid_k * n_h  # fts per row block
                                + 2 * n_pad * n_h             # outputs
                                + n_h + 1)),                  # bias + slope (once)
    )

    out_spec = pl.BlockSpec((bm, n_h), lambda i, k: (i, 0))
    out_a, out_b = pl.pallas_call(
        _gcn_pair_kernel,
        out_shape=(jax.ShapeDtypeStruct((n_pad, n_h), jnp.float32),) * 2,
        grid=(grid_m, grid_k),
        in_specs=[
            pl.BlockSpec((bk, n_h), lambda i, k: (k, 0)),     # fts_a chunk
            pl.BlockSpec((bk, n_h), lambda i, k: (k, 0)),     # fts_b chunk
            pl.BlockSpec((bm, bk), lambda i, k: (i, k)),      # adjacency tile
            pl.BlockSpec((1, n_h), lambda i, k: (0, 0)),      # bias (resident)
            SMEM_SPEC,                                        # PReLU slope
        ],
        out_specs=(out_spec, out_spec),
        scratch_shapes=[pltpu.VMEM((bm, n_h), jnp.float32),
                        pltpu.VMEM((bm, n_h), jnp.float32)],
        compiler_params=pltpu.CompilerParams(
            dimension_semantics=("parallel", "arbitrary"),
            vmem_limit_bytes=48 * MIB),
        cost_estimate=cost,
    )(fts_a, fts_b, adj_p, bias, prelu_a)

    if n_pad != n:
        out_a = out_a[:n]
        out_b = out_b[:n]
    return out_a, out_b


# ------------------------------------------------------------------
# Clusterator: soft k-means iterations, transpose-free formulation.
# Internally keeps r transposed as (K, N) (lane-dense); returns (mu, r^T).
# ------------------------------------------------------------------
def _cluster_kernel(data_ref, mu0_ref, gama_ref, mu_out_ref, rt_out_ref, *, num_iter):
    data = data_ref[...]                                    # (N, n_h)
    n = data.shape[0]
    k = mu0_ref.shape[0]
    inv_gama = 1.0 / gama_ref[0]

    sumsq = jnp.sum(data * data, axis=1, keepdims=True)
    # data / max(||data||, eps)  ==  data * rsqrt(max(||data||^2, eps^2))
    data_norm = data * lax.rsqrt(jnp.maximum(sumsq, EPS * EPS))

    def body(_, carry):
        mu, _rt = carry
        mu_sumsq = jnp.sum(mu * mu, axis=1, keepdims=True)
        mu_norm = mu * lax.rsqrt(jnp.maximum(mu_sumsq, EPS * EPS))        # (K, n_h)
        # dist^T[k, n] = <mu_norm[k], data_norm[n]>
        dist_t = lax.dot_general(mu_norm, data_norm, (((1,), (1,)), ((), ())),
                                 preferred_element_type=jnp.float32)      # (K, N)
        logits = dist_t * inv_gama
        logits = logits - jnp.max(logits, axis=0, keepdims=True)          # stable softmax over K
        e = jnp.exp(logits)
        r_t = e / jnp.sum(e, axis=0, keepdims=True)                       # exact division
        cluster_r = jnp.sum(r_t, axis=1, keepdims=True)                   # (K, 1)
        cluster_mean = jnp.dot(r_t, data, preferred_element_type=jnp.float32)  # (K, n_h)
        new_mu = cluster_mean / cluster_r                                 # exact (matches torch)
        return new_mu, r_t

    mu, r_t = lax.fori_loop(0, num_iter, body,
                            (mu0_ref[...], jnp.zeros((k, n), jnp.float32)),
                            unroll=True)
    mu_out_ref[...] = mu
    rt_out_ref[...] = r_t


def clusterator(embeds, mu_init, gama, num_iter=11):
    # TODO(synk): for very large graphs this single-block design should be
    # tiled over N (accumulate cluster_mean / cluster_r per iteration).
    n, n_h = embeds.shape
    k = mu_init.shape[0]
    return pl.pallas_call(
        functools.partial(_cluster_kernel, num_iter=num_iter),
        out_shape=(jax.ShapeDtypeStruct((k, n_h), jnp.float32),
                   jax.ShapeDtypeStruct((k, n), jnp.float32)),   # r returned transposed
        in_specs=[VMEM_SPEC, VMEM_SPEC, SMEM_SPEC],
        out_specs=(VMEM_SPEC, VMEM_SPEC),
        compiler_params=pltpu.CompilerParams(vmem_limit_bytes=48 * MIB),
    )(embeds, mu_init, gama)


# ------------------------------------------------------------------
# Fused tail: bilinear discriminator (with readout + sigmoid) AND cluster
# discriminator (with z = sigmoid(r @ mu)) in a single pallas_call so the
# four (N, n_h) embeddings are read from HBM exactly once.
#   ret :  (4, N) lane-dense rows (sc_1, sc_2, sc_3, sc_4)
#   ret2:  (N, 4) columns (sc_1, sc_2, sc_3, sc_4)
# ------------------------------------------------------------------
def _disc_fused_kernel(h1_ref, h2_ref, h3_ref, h4_ref, w_ref,
                       rt1_ref, mu1_ref, rt2_ref, mu2_ref, b_ref,
                       ret_ref, ret2_ref):
    h1 = h1_ref[...]
    h2 = h2_ref[...]
    h3 = h3_ref[...]
    h4 = h4_ref[...]

    # --- bilinear discriminator: sc = h_j @ W @ c_k + b ---
    c1 = jax.nn.sigmoid(jnp.mean(h1, axis=0, keepdims=True))      # (1, d)
    c2 = jax.nn.sigmoid(jnp.mean(h2, axis=0, keepdims=True))      # (1, d)
    c12 = jnp.concatenate([c1, c2], axis=0)                        # (2, d)
    v = lax.dot_general(c12, w_ref[...], (((1,), (1,)), ((), ())),
                        preferred_element_type=jnp.float32)        # (2, d): v[k] = W @ c_k
    v1 = v[0:1, :]
    v2 = v[1:2, :]
    bias = b_ref[0]

    def row_scores(vv, h):   # (1,d) . (N,d) -> (1,N), lane-dense
        return lax.dot_general(vv, h, (((1,), (1,)), ((), ())),
                               preferred_element_type=jnp.float32)

    ret_ref[...] = jnp.concatenate(
        [row_scores(v1, h2), row_scores(v2, h1),
         row_scores(v1, h4), row_scores(v2, h3)], axis=0) + bias   # (4, N)

    # --- cluster discriminator: sc_i[n] = <h_j[n], z_k[n]> ---
    z1 = jax.nn.sigmoid(
        lax.dot_general(rt1_ref[...], mu1_ref[...], (((0,), (0,)), ((), ())),
                        preferred_element_type=jnp.float32))       # (N, d)
    z2 = jax.nn.sigmoid(
        lax.dot_general(rt2_ref[...], mu2_ref[...], (((0,), (0,)), ((), ())),
                        preferred_element_type=jnp.float32))
    sc1 = jnp.sum(h2 * z1, axis=1, keepdims=True)
    sc2 = jnp.sum(h1 * z2, axis=1, keepdims=True)
    sc3 = jnp.sum(h4 * z1, axis=1, keepdims=True)
    sc4 = jnp.sum(h3 * z2, axis=1, keepdims=True)
    # TODO(synk): a lane-dense (4, N) store here needs an in-kernel (N,4)->(4,N)
    # transpose of a sub-(8,128) tile; kept (N,4) + wrapper transpose.
    ret2_ref[...] = jnp.concatenate([sc1, sc2, sc3, sc4], axis=1)  # (N, 4)


def disc_fused(h1, h2, h3, h4, w_bil, b_bil, rt1, mu1, rt2, mu2):
    n = h1.shape[0]
    ret, ret2 = pl.pallas_call(
        _disc_fused_kernel,
        out_shape=(jax.ShapeDtypeStruct((4, n), jnp.float32),
                   jax.ShapeDtypeStruct((n, 4), jnp.float32)),
        in_specs=[VMEM_SPEC] * 9 + [SMEM_SPEC],
        out_specs=(VMEM_SPEC, VMEM_SPEC),
        compiler_params=pltpu.CompilerParams(vmem_limit_bytes=48 * MIB),
    )(h1, h2, h3, h4, w_bil, rt1, mu1, rt2, mu2, b_bil)
    # rows already ordered (sc_1, sc_2, sc_3, sc_4) -> matches torch.cat
    return ret.reshape(-1), ret2.T.reshape(-1)


# ------------------------------------------------------------------
# MVGRL forward
# ------------------------------------------------------------------
def mvgrl_forward(params, seq1, seq2, seq3, seq4, adj, diff):
    wt, b, a = params["gcn_wt"], params["gcn_b"], params["prelu_a"]
    # h1/h3 share adj and h2/h4 share diff -> each N x N matrix streamed once.
    h1, h3 = gcn_pair_forward(seq1, seq3, adj, wt, b, a)
    h2, h4 = gcn_pair_forward(seq2, seq4, diff, wt, b, a)

    mu1, rt1 = clusterator(h1, params["cluster1_init"], params["gama"])
    mu2, rt2 = clusterator(h2, params["cluster2_init"], params["gama"])

    ret, ret2 = disc_fused(h1, h2, h3, h4, params["bil_w"], params["bil_b"],
                           rt1, mu1, rt2, mu2)
    # NOTE: tau is unused in the reference forward pass (kept for parity).
    return ret, ret2, h1, h2


def init_params(key, n_in, n_h, num_clusters, gama):
    k_w, k_bw, k_bb, k_c1, k_c2 = jax.random.split(key, 5)
    # GCN Linear weight (xavier-uniform-like init) stored pre-transposed (n_in, n_h)
    limit = jnp.sqrt(6.0 / (n_in + n_h))
    gcn_wt = jax.random.uniform(k_w, (n_in, n_h), jnp.float32, -limit, limit)
    gcn_b = jnp.zeros((1, n_h), jnp.float32)
    prelu_a = jnp.full((1,), 0.25, jnp.float32)            # nn.PReLU() default
    # nn.Bilinear(n_h, n_h, 1): weight (1, n_h, n_h) -> use the (n_h, n_h) slab
    blim = 1.0 / jnp.sqrt(jnp.float32(n_h))
    bil_w = jax.random.uniform(k_bw, (n_h, n_h), jnp.float32, -blim, blim)
    bil_b = jax.random.uniform(k_bb, (1,), jnp.float32, -blim, blim)
    # Clusterator init: torch.rand(K, n_h)
    c1 = jax.random.uniform(k_c1, (num_clusters, n_h), jnp.float32)
    c2 = jax.random.uniform(k_c2, (num_clusters, n_h), jnp.float32)
    return {
        "gcn_wt": gcn_wt, "gcn_b": gcn_b, "prelu_a": prelu_a,
        "bil_w": bil_w, "bil_b": bil_b,
        "cluster1_init": c1, "cluster2_init": c2,
        "gama": jnp.array([gama], jnp.float32),
    }


if __name__ == "__main__":
    N, N_IN, N_H, K = 8, 16, 32, 4
    TAU, GAMA = 0.5, 0.5

    key = jax.random.PRNGKey(0)
    kp, k1, k2, k3, k4, ka, kd = jax.random.split(key, 7)

    params = init_params(kp, N_IN, N_H, K, GAMA)

    seq1 = jax.random.normal(k1, (N, N_IN), jnp.float32)
    seq2 = jax.random.normal(k2, (N, N_IN), jnp.float32)
    seq3 = jax.random.normal(k3, (N, N_IN), jnp.float32)
    seq4 = jax.random.normal(k4, (N, N_IN), jnp.float32)
    adj = jax.random.uniform(ka, (N, N), jnp.float32)
    diff = jax.random.uniform(kd, (N, N), jnp.float32)

    ret, ret2, h1, h2 = mvgrl_forward(params, seq1, seq2, seq3, seq4, adj, diff)
    jax.block_until_ready((ret, ret2, h1, h2))

    assert ret.shape == (4 * N,)
    assert ret2.shape == (4 * N,)
    assert h1.shape == (N, N_H) and h2.shape == (N, N_H)
    assert bool(jnp.all(jnp.isfinite(ret))) and bool(jnp.all(jnp.isfinite(ret2)))
    print("KERNEL_OK")
</pallas_src>

<mosaic_0001>
module attributes {stable_mosaic.version = 11 : i64} {
  func.func @_fts_pair_kernel(%arg0: i32, %arg1: memref<8x16xf32, #tpu.memory_space<vmem>>, %arg2: memref<8x16xf32, #tpu.memory_space<vmem>>, %arg3: memref<16x32xf32, #tpu.memory_space<vmem>>, %arg4: memref<8x32xf32, #tpu.memory_space<vmem>>, %arg5: memref<8x32xf32, #tpu.memory_space<vmem>>) attributes {dimension_semantics = [#tpu.dimension_semantics<parallel>], iteration_bounds = array<i64: 1>, scalar_prefetch = 0 : i64, scratch_operands = 0 : i64, tpu.core_type = #tpu.core_type<tc>, window_params = [{transform_indices = @transform_0, window_bounds = array<i64: 8, 16>}, {transform_indices = @transform_1, window_bounds = array<i64: 8, 16>}, {pipeline_mode = #tpu.pipeline_mode<synchronous>, transform_indices = @transform_2, window_bounds = array<i64: 16, 32>}, {transform_indices = @transform_3, window_bounds = array<i64: 8, 32>}, {transform_indices = @transform_4, window_bounds = array<i64: 8, 32>}]} {
    %c0 = arith.constant 0 : index
    %c0_0 = arith.constant 0 : index
    %0 = vector.load %arg3[%c0, %c0_0] : memref<16x32xf32, #tpu.memory_space<vmem>>, vector<16x32xf32>
    %c0_1 = arith.constant 0 : index
    %c0_2 = arith.constant 0 : index
    %1 = vector.load %arg1[%c0_1, %c0_2] : memref<8x16xf32, #tpu.memory_space<vmem>>, vector<8x16xf32>
    %cst = arith.constant dense<0.000000e+00> : vector<8x32xf32>
    %2 = tpu.matmul %1, %0, %cst {dimension_numbers = #tpu.dot_dimension_numbers<[1], [0], [0], [1], [0, 0, 1, 1], [], []>} : vector<8x16xf32>, vector<16x32xf32>, vector<8x32xf32> -> vector<8x32xf32>
    %c0_3 = arith.constant 0 : index
    %c0_4 = arith.constant 0 : index
    %3 = vector.load %arg4[%c0_3, %c0_4] : memref<8x32xf32, #tpu.memory_space<vmem>>, vector<8x32xf32>
    tpu.vector_store %arg4[%c0_3, %c0_4], %2 {strides = array<i32>} : memref<8x32xf32, #tpu.memory_space<vmem>>, vector<8x32xf32>,
    %c0_5 = arith.constant 0 : index
    %c0_6 = arith.constant 0 : index
    %4 = vector.load %arg2[%c0_5, %c0_6] : memref<8x16xf32, #tpu.memory_space<vmem>>, vector<8x16xf32>
    %cst_7 = arith.constant dense<0.000000e+00> : vector<8x32xf32>
    %5 = tpu.matmul %4, %0, %cst_7 {dimension_numbers = #tpu.dot_dimension_numbers<[1], [0], [0], [1], [0, 0, 1, 1], [], []>} : vector<8x16xf32>, vector<16x32xf32>, vector<8x32xf32> -> vector<8x32xf32>
    %c0_8 = arith.constant 0 : index
    %c0_9 = arith.constant 0 : index
    %6 = vector.load %arg5[%c0_8, %c0_9] : memref<8x32xf32, #tpu.memory_space<vmem>>, vector<8x32xf32>
    tpu.vector_store %arg5[%c0_8, %c0_9], %5 {strides = array<i32>} : memref<8x32xf32, #tpu.memory_space<vmem>>, vector<8x32xf32>,
    return
  }
  func.func @transform_0(%arg0: i32) -> (i32, i32) {
    %c0_i32 = arith.constant 0 : i32
    %c0_i32_0 = arith.constant 0 : i32
    return %arg0, %c0_i32 : i32, i32
  }
  func.func @transform_1(%arg0: i32) -> (i32, i32) {
    %c0_i32 = arith.constant 0 : i32
    %c0_i32_0 = arith.constant 0 : i32
    return %arg0, %c0_i32 : i32, i32
  }
  func.func @transform_2(%arg0: i32) -> (i32, i32) {
    %c0_i32 = arith.constant 0 : i32
    %c0_i32_0 = arith.constant 0 : i32
    %c0_i32_1 = arith.constant 0 : i32
    return %c0_i32, %c0_i32_0 : i32, i32
  }
  func.func @transform_3(%arg0: i32) -> (i32, i32) {
    %c0_i32 = arith.constant 0 : i32
    %c0_i32_0 = arith.constant 0 : i32
    return %arg0, %c0_i32 : i32, i32
  }
  func.func @transform_4(%arg0: i32) -> (i32, i32) {
    %c0_i32 = arith.constant 0 : i32
    %c0_i32_0 = arith.constant 0 : i32
    return %arg0, %c0_i32 : i32, i32
  }
}

</mosaic_0001>

<bundles_post_ra>
// kernel: tpu_custom_call.1
= control target key start
LH: loop header
LB: loop body
LE: loop exit
PB: predicated region body
PF: predicated region fallthrough
CT: control target
= control target key end

     0   :  { %10 = vsyncpa [#allocation3], 0  ;;  %s497_s0 = inlined_call_operand.hbm [shape: f32[8,16], index: 0, kind: input, shape index: {}]   ;;  %s498_s1 = inlined_call_operand.hbm [shape: f32[8,16], index: 1, kind: input, shape index: {}]   ;;  %s499_s2 = inlined_call_operand.hbm [shape: f32[16,32], index: 2, kind: input, shape index: {}]   ;;  %s500_s3 = inlined_call_operand.hbm [shape: f32[8,32], index: 3, kind: output, shape index: {0}]   ;;  %s501_s4 = inlined_call_operand.hbm [shape: f32[8,32], index: 4, kind: output, shape index: {1}]  }
   0x1   :  { %11 = vsyncpa [#allocation6], 0 }
   0x2   :  { %12 = vsyncpa [#allocation4], 0 }
   0x3   :  { %13 = vsyncpa [#allocation10], 0  ;;  %s395_s15 = smov [#allocation5]   ;;  %s396_s17 = smov [#allocation2]  }
   0x4   :  { %s30_s16 = sshll.u32 %s395_s15, 4  ;;  %s20_s18 = sshll.u32 %s396_s17, 4  ;;  %s31_s16 = int_to_ptr.vmem [resolvable:$true] %s30_s16  ;;  %s21_s18 = int_to_ptr.vmem [resolvable:$true] %s20_s18 }
   0x5   :  { %s277_s21 = scalar_lea.hbm %s498_s1, 128 }
   0x6   :  { %p278_p0 = scmp.ne.s32.totalorder %s498_s1, %s277_s21  ;;  %p281_p1 = scmp.lt.u32.totalorder %s277_s21, %s498_s1 }
   0x8   :  { %p283_p2 = pnand %p281_p1, %p278_p0 }
   0xa   :  { %286 = shalt.err (!%p283_p2)
}
   0xb   :  { %s287_s26 = scalar_lea.vmem %s31_s16, 128  ;;  %p292_p4 = scmp.lt.s32.totalorder %s31_s16, %s31_s16 }
   0xc   :  { %p288_p3 = scmp.ne.s32.totalorder %s31_s16, %s287_s26  ;;  %p293_p5 = scmp.lt.s32.totalorder %s287_s26, %s287_s26 }
   0xe   :  { %p294_p6 = por %p293_p5, %p292_p4 }
  0x10   :  { %p295_p7 = pnand %p294_p6, %p288_p3 }
  0x12   :  { %298 = shalt.err (!%p295_p7)
}
  0x13   :  { %33 = dma.hbm_to_vmem [thread:$0]  %s498_s1, 128, %s31_s16, [#allocation6]  }
  0x14   :  { %s299_s5 = scalar_lea.hbm %s497_s0, 128 }
  0x15   :  { %p300_p8 = scmp.ne.s32.totalorder %s497_s0, %s299_s5  ;;  %p303_p9 = scmp.lt.u32.totalorder %s299_s5, %s497_s0 }
  0x17   :  { %p305_p10 = pnand %p303_p9, %p300_p8 }
  0x19   :  { %308 = shalt.err (!%p305_p10)
}
  0x1a   :  { %s309_s10 = scalar_lea.vmem %s21_s18, 128  ;;  %p314_p12 = scmp.lt.s32.totalorder %s21_s18, %s21_s18 }
  0x1b   :  { %p310_p11 = scmp.ne.s32.totalorder %s21_s18, %s309_s10  ;;  %p315_p13 = scmp.lt.s32.totalorder %s309_s10, %s309_s10 }
  0x1d   :  { %p316_p0 = por %p315_p13, %p314_p12 }
  0x1f   :  { %p317_p1 = pnand %p316_p0, %p310_p11 }
  0x21   :  { %320 = shalt.err (!%p317_p1)
}
  0x22   :  { %23 = dma.hbm_to_vmem [thread:$0]  %s497_s0, 128, %s21_s18, [#allocation3]  }
  0x23   :  { %s397_s12 = smov [#allocation7]   ;;  %s321_s16 = scalar_lea.hbm %s499_s2, 256 }
  0x24   :  { %s39_s13 = sshll.u32 %s397_s12, 4  ;;  %p322_p2 = scmp.ne.s32.totalorder %s499_s2, %s321_s16  ;;  %s40_s13 = int_to_ptr.vmem [resolvable:$true] %s39_s13 }
  0x25   :  { %p325_p3 = scmp.lt.u32.totalorder %s321_s16, %s499_s2 }
  0x27   :  { %p327_p4 = pnand %p325_p3, %p322_p2 }
  0x29   :  { %330 = shalt.err (!%p327_p4)
}
  0x2a   :  { %s331_s22 = scalar_lea.vmem %s40_s13, 256  ;;  %p336_p6 = scmp.lt.s32.totalorder %s40_s13, %s40_s13 }
  0x2b   :  { %p332_p5 = scmp.ne.s32.totalorder %s40_s13, %s331_s22  ;;  %p337_p7 = scmp.lt.s32.totalorder %s331_s22, %s331_s22 }
  0x2d   :  { %p338_p8 = por %p337_p7, %p336_p6 }
  0x2f   :  { %p339_p9 = pnand %p338_p8, %p332_p5 }
  0x31   :  { %342 = shalt.err (!%p339_p9)
}
  0x32   :  { %s398_s0 = smov 128   ;;  %s399_s18 = smov 8  }
  0x33   :  { %45 = dma.hbm_to_vmem [thread:$0]  %s499_s2, 256, %s40_s13, [#allocation6], %s398_s0, %s398_s0, %s399_s18  }
  0x34   :  { %387 = dma.done.wait [#allocation3], 128  }
  0x35   :  { %388 = vsyncadd [#allocation3], 4294967168 }
  0x36   :  { %389 = dma.done.wait [#allocation6], 384  }
  0x37   :  { %390 = vsyncadd [#allocation6], 4294966912  ;;  %v400_v0 = vmov 0.0|0.0   ;;  %vm401_vm0 = vmmov 0   ;;  %v402_v1 = vmov 0.0   ;;  %v55_v2 = vld [vmem:[#allocation7] sm:$0xff] }
  0x38   :  { %261 = vmatprep.subr.bf16.mxu0 %v400_v0  ;;  %264 = vmatprep.subr.bf16.mxu1 %v400_v0  ;;  %v56_v3 = vld [vmem:[#allocation7 + $0x8] sm:$0xff]  ;;  %v57_v5 = vld [vmem:[#allocation2] sm:$0xff]  ;;  %vm58_vm1 = vcmask 130048   ;;  %v134_v6 = vld [vmem:[#allocation5] sm:$0xff]  ;;  %s403_s2 = smov [#allocation8]   ;;  %s404_s26 = smov [#allocation9]  }
  0x39   :  { %251 = vmatprep.mubr.msk.f32.mxu0 %vm401_vm0, %v402_v1  ;;  %258 = vmatprep.mubr.msk.f32.mxu1 %vm401_vm0, %v402_v1  ;;  %v262_v4 = vpack.c.bf16 %v56_v3, %v55_v2  ;;  %s215_s25 = sshll.u32 %s403_s2, 4  ;;  %s225_s27 = sshll.u32 %s404_s26, 4  ;;  %vm132_vm2 = vcmask 261120   ;;  %s216_s25 = int_to_ptr.vmem [resolvable:$true] %s215_s25  ;;  %s466_s27 = int_to_ptr.vmem [resolvable:$true] %s225_s27 }
  0x3a   :  { %s343_s28 = scalar_lea.vmem %s216_s25, 128  ;;  %p348_p11 = scmp.lt.s32.totalorder %s216_s25, %s216_s25 }
  0x3b   :  { %263 = vmatpush3.bf16.msra.mxu0 %v262_v4  ;;  %266 = vmatpush3.bf16.msra.mxu1 %v262_v4  ;;  %p344_p10 = scmp.ne.s32.totalorder %s216_s25, %s343_s28  ;;  %p349_p12 = scmp.lt.s32.totalorder %s343_s28, %s343_s28 }
  0x3d   :  { %p350_p13 = por %p349_p12, %p348_p11 }
  0x3e   :  { %252 = vmatmul.mubr.msk.f32.vlgmr.msra.gmra.mrb[0].mxu0 %vm58_vm1, %v57_v5  ;;  %259 = vmatmul.mubr.msk.f32.vlgmr.msra.gmra.mrb[0].mxu1 %vm58_vm1, %v134_v6 }
  0x3f   :  { %p351_p0 = pnand %p350_p13, %p344_p10 }
 0x111   :  { %v128_v7 = vpop.f32.mrb[0].mxu0  ;;  %v204_v8 = vpop.f32.mrb[0].mxu1 }
 0x112   :  { %v253_v9 = vpop.f32.mrb[1].mxu0  ;;  %v260_v10 = vpop.f32.mrb[1].mxu1  ;;  %133 = vst.msk [vmem:[#allocation8] sm:$0xff] %vm132_vm2, %v128_v7  ;;  %208 = vst.msk [vmem:[#allocation9] sm:$0xff] %vm132_vm2, %v204_v8 }
 0x113   :  { %354 = shalt.err (!%p351_p0)
}
 0x114   :  { %s355_s5 = scalar_lea.hbm %s500_s3, 128 }
 0x115   :  { %p356_p1 = scmp.ne.s32.totalorder %s500_s3, %s355_s5  ;;  %p359_p2 = scmp.lt.u32.totalorder %s355_s5, %s500_s3 }
 0x117   :  { %p361_p3 = pnand %p359_p2, %p356_p1 }
 0x119   :  { %364 = shalt.err (!%p361_p3)
}
 0x11a   :  { %218 = dma.vmem_to_hbm [thread:$0]  %s216_s25, 128, %s500_s3, [#allocation4]  }
 0x11b   :  { %s365_s11 = scalar_lea.vmem %s466_s27, 128  ;;  %p370_p5 = scmp.lt.s32.totalorder %s466_s27, %s466_s27 }
 0x11c   :  { %p366_p4 = scmp.ne.s32.totalorder %s466_s27, %s365_s11  ;;  %p371_p6 = scmp.lt.s32.totalorder %s365_s11, %s365_s11 }
 0x11e   :  { %p372_p7 = por %p371_p6, %p370_p5 }
 0x120   :  { %p373_p8 = pnand %p372_p7, %p366_p4 }
 0x122   :  { %376 = shalt.err (!%p373_p8)
}
 0x123   :  { %s377_s14 = scalar_lea.hbm %s501_s4, 128 }
 0x124   :  { %p378_p9 = scmp.ne.s32.totalorder %s501_s4, %s377_s14  ;;  %p381_p10 = scmp.lt.u32.totalorder %s377_s14, %s501_s4 }
 0x126   :  { %p383_p11 = pnand %p381_p10, %p378_p9 }
 0x128   :  { %386 = shalt.err (!%p383_p11)
}
 0x129   :  { %228 = dma.vmem_to_hbm [thread:$0]  %s466_s27, 128, %s501_s4, [#allocation10]  }
 0x12a   :  { %391 = dma.done.wait [#allocation4], 128  }
 0x12b   :  { %392 = vsyncadd [#allocation4], 4294967168 }
 0x12c   :  { %393 = dma.done.wait [#allocation10], 128  }
 0x12d   :  { %394 = vsyncadd [#allocation10], 4294967168 }
 0x12e   :  { %235 = vsyncpa [#allocation3], 1 }
 0x12f   :  { %236 = vsyncpa [#allocation6], 1 }
 0x130   :  { %237 = vsyncpa [#allocation4], 1 }
 0x131   :  { %238 = vsyncpa [#allocation10], 1 }

</bundles_post_ra>
